<compile_context>
chip_gen: v5e
topology: v5e:2x2
jax: 0.10.0
libtpu: 0.0.40
codegen_flags: <defaults>
</compile_context>

<pallas_src>
import jax
import jax.numpy as jnp
from jax.experimental import pallas as pl
from jax.experimental.pallas import tpu as pltpu

_LANE = 128
_SUBLANE = 8
_MIN_GRID_STEPS = 4            # keep pipeline + megacore engaged on mid-size tensors
_VMEM_LIMIT_BYTES = 48 << 20   # safe on v5e/v6e (128 MiB phys) and v7x (64 MiB phys)
_QMIN = -128.0
_QMAX = 127.0


def _round_up(x: int, m: int) -> int:
    return ((x + m - 1) // m) * m


def _pick_block_bytes() -> int:
    """Per-generation input-block size in bytes."""
    try:
        info = pltpu.get_tpu_info()
        vmem = getattr(info, "vmem_capacity_bytes", None)
        if vmem is not None and vmem <= (64 << 20):
            # v7x: 64 MiB VMEM/TC, ~3.2 TB/s HBM -> bigger blocks amortize the
            # ~0.35 us per-grid-step overhead.
            return 8 << 20
    except Exception:
        pass
    return 4 << 20  # v5e / v6e / fallback


def _floor_fq_kernel(params_ref, x_ref, o_ref):
    """Elementwise floor + symmetric int8 fake-quant (quant-dequant).

    params_ref: (2,) f32 in SMEM = [scale, 1/scale]."""
    scale = params_ref[0]
    inv_scale = params_ref[1]
    x = x_ref[...]
    if x.dtype != jnp.float32:          # trace-time branch; no-op for f32 inputs
        x = x.astype(jnp.float32)
    y = jnp.floor(x)
    q = jnp.clip(jnp.round(y * inv_scale), _QMIN, _QMAX)
    o_ref[...] = (q * scale).astype(o_ref.dtype)


def _fake_quant_floor_ref(x, scale, inv_scale):
    """Plain-jnp fallback for tiny / non-lane-aligned tails."""
    y = jnp.floor(x.astype(jnp.float32))
    q = jnp.clip(jnp.round(y * inv_scale), _QMIN, _QMAX)
    return (q * scale).astype(x.dtype)


def qat_floor(x: jax.Array, scale) -> jax.Array:
    """QAT Floor forward. x: float array (any shape). Returns same shape/dtype.

    `scale` may be a Python float or a traced jnp scalar (live observer scale);
    either way it is passed to the kernel through SMEM (no recompilation)."""
    orig_shape = x.shape
    orig_dtype = x.dtype

    scale_f32 = jnp.asarray(scale, jnp.float32).reshape(())
    inv_scale_f32 = jnp.float32(1.0) / scale_f32
    params = jnp.stack([scale_f32, inv_scale_f32])       # (2,) f32 -> SMEM

    n = x.size
    flat = x.reshape(-1)
    n_main = (n // _LANE) * _LANE

    if n_main == 0:
        # Whole tensor smaller than one lane row: not worth a kernel launch.
        return _fake_quant_floor_ref(flat, scale_f32, inv_scale_f32).reshape(orig_shape)

    main = flat if n_main == n else flat[:n_main]
    x2d = main.reshape(-1, _LANE)                         # lane-dense slab
    rows = x2d.shape[0]

    itemsize = jnp.dtype(orig_dtype).itemsize
    sublane = max(_SUBLANE, 32 // max(itemsize, 1))       # 8 for f32, 16 for bf16

    block_bytes = _pick_block_bytes()
    max_block_rows = max(sublane,
                         (block_bytes // (itemsize * _LANE)) // sublane * sublane)

    if rows <= sublane:
        block_rows = rows                                 # single full-extent block
    else:
        # Keep at least ~_MIN_GRID_STEPS steps so double-buffering overlaps
        # DMA-in / compute / DMA-out and v7x can split the axis across its 2 TCs.
        target = _round_up(pl.cdiv(rows, _MIN_GRID_STEPS), sublane)
        block_rows = min(max_block_rows, max(target, sublane))
    grid = (pl.cdiv(rows, block_rows),)                   # partial last block is masked

    cost = pl.CostEstimate(flops=6 * n_main,
                           transcendentals=0,
                           bytes_accessed=2 * n_main * itemsize)

    out2d = pl.pallas_call(
        _floor_fq_kernel,
        out_shape=jax.ShapeDtypeStruct((rows, _LANE), orig_dtype),
        grid=grid,
        in_specs=[
            pl.BlockSpec(memory_space=pltpu.MemorySpace.SMEM),       # [scale, 1/scale]
            pl.BlockSpec((block_rows, _LANE), lambda i: (i, 0)),
        ],
        out_specs=pl.BlockSpec((block_rows, _LANE), lambda i: (i, 0)),
        compiler_params=pltpu.CompilerParams(
            dimension_semantics=("parallel",),
            vmem_limit_bytes=_VMEM_LIMIT_BYTES,
        ),
        cost_estimate=cost,
    )(params, x2d)

    out_flat = out2d.reshape(-1)
    if n_main != n:
        # Handle the <128-element tail without a full-tensor pad copy.
        tail_out = _fake_quant_floor_ref(flat[n_main:], scale_f32, inv_scale_f32)
        out_flat = jnp.concatenate([out_flat, tail_out])
    return out_flat.reshape(orig_shape)


if __name__ == "__main__":
    key = jax.random.PRNGKey(0)
    # Small NCHW activation tensor.
    x = jax.random.uniform(key, (2, 4, 16, 16), dtype=jnp.float32,
                           minval=-8.0, maxval=8.0)

    # Deterministic "qconfig" activation scale (synthetic, no checkpoint):
    # int8 range covers the floored outputs exactly.
    act_scale = 8.0 / 127.0

    out = qat_floor(x, act_scale)
    out = jax.block_until_ready(out)

    # Reference: floor then symmetric int8 fake-quant in plain JAX.
    ref = jnp.clip(jnp.round(jnp.floor(x) / act_scale), -128, 127) * act_scale
    assert out.shape == x.shape and out.dtype == x.dtype
    assert jnp.max(jnp.abs(out - ref)) < 1e-5

    print("KERNEL_OK")
</pallas_src>

<mosaic_0001>
module attributes {stable_mosaic.version = 11 : i64} {
  func.func @_floor_fq_kernel(%arg0: i32, %arg1: memref<2xf32, #tpu.memory_space<smem>>, %arg2: memref<8x128xf32, #tpu.memory_space<vmem>>, %arg3: memref<8x128xf32, #tpu.memory_space<vmem>>) attributes {dimension_semantics = [#tpu.dimension_semantics<parallel>], iteration_bounds = array<i64: 2>, scalar_prefetch = 0 : i64, scratch_operands = 0 : i64, tpu.core_type = #tpu.core_type<tc>, window_params = [{transform_indices = @transform_0, window_bounds = array<i64: 2>}, {transform_indices = @transform_1, window_bounds = array<i64: 8, 128>}, {transform_indices = @transform_2, window_bounds = array<i64: 8, 128>}]} {
    %c0 = arith.constant 0 : index
    %0 = memref.load %arg1[%c0] : memref<2xf32, #tpu.memory_space<smem>>
    %c1 = arith.constant 1 : index
    %1 = memref.load %arg1[%c1] : memref<2xf32, #tpu.memory_space<smem>>
    %c0_0 = arith.constant 0 : index
    %c0_1 = arith.constant 0 : index
    %2 = vector.load %arg2[%c0_0, %c0_1] : memref<8x128xf32, #tpu.memory_space<vmem>>, vector<8x128xf32>
    %3 = math.floor %2 : vector<8x128xf32>
    %4 = vector.broadcast %1 : f32 to vector<8x128xf32>
    %5 = arith.mulf %3, %4 : vector<8x128xf32>
    %6 = math.roundeven %5 : vector<8x128xf32>
    %cst = arith.constant -1.280000e+02 : f32
    %cst_2 = arith.constant 1.270000e+02 : f32
    %7 = vector.broadcast %cst : f32 to vector<8x128xf32>
    %8 = arith.maximumf %7, %6 : vector<8x128xf32>
    %9 = vector.broadcast %cst_2 : f32 to vector<8x128xf32>
    %10 = arith.minimumf %9, %8 : vector<8x128xf32>
    %11 = vector.broadcast %0 : f32 to vector<8x128xf32>
    %12 = arith.mulf %10, %11 : vector<8x128xf32>
    %c0_3 = arith.constant 0 : index
    %c0_4 = arith.constant 0 : index
    %13 = vector.load %arg3[%c0_3, %c0_4] : memref<8x128xf32, #tpu.memory_space<vmem>>, vector<8x128xf32>
    tpu.vector_store %arg3[%c0_3, %c0_4], %12 {strides = array<i32>} : memref<8x128xf32, #tpu.memory_space<vmem>>, vector<8x128xf32>,
    return
  }
  func.func @transform_0(%arg0: i32) -> i32 {
    %c0_i32 = arith.constant 0 : i32
    %c0_i32_0 = arith.constant 0 : i32
    return %c0_i32 : i32
  }
  func.func @transform_1(%arg0: i32) -> (i32, i32) {
    %c0_i32 = arith.constant 0 : i32
    %c0_i32_0 = arith.constant 0 : i32
    return %arg0, %c0_i32 : i32, i32
  }
  func.func @transform_2(%arg0: i32) -> (i32, i32) {
    %c0_i32 = arith.constant 0 : i32
    %c0_i32_0 = arith.constant 0 : i32
    return %arg0, %c0_i32 : i32, i32
  }
}

</mosaic_0001>

<bundles_post_ra>
// kernel: tpu_custom_call.1
= control target key start
LH: loop header
LB: loop body
LE: loop exit
PB: predicated region body
PF: predicated region fallthrough
CT: control target
= control target key end

     0   :  { %7 = vsyncpa [#allocation5], 0  ;;  %s636_s0 = inlined_call_operand.hbm [shape: f32[2], index: 0, kind: input, shape index: {}]   ;;  %s637_s1 = inlined_call_operand.hbm [shape: f32[16,128], index: 1, kind: input, shape index: {}]   ;;  %s638_s2 = inlined_call_operand.hbm [shape: f32[16,128], index: 2, kind: output, shape index: {}]  }
   0x1   :  { %8 = vsyncpa [#allocation3], 0 }
   0x2   :  { %10 = vsyncpa [#allocation3 + $0x1], 0 }
   0x3   :  { %11 = vsyncpa [#allocation4], 0 }
   0x4   :  { %13 = vsyncpa [#allocation4 + $0x1], 0  ;;  %s498_s9 = smov 0   ;;  %s500_s10 = smov 0  }
   0x5   :  { %s502_s11 = smov 0   ;;  %s504_s12 = smov 0  }
   0x6 LB: > { %s519_s13 = sadd.s32 4294967295, %s480_s12   ;;  %s285_s14 = sadd.s32 4294967294, %s480_s12   ;;  %s480_s12 = sphi %s504_s12, %s648_s12   ;;  %s476_s11 = sphi %s502_s11, %s647_s11   ;;  %s472_s10 = sphi %s500_s10, %s646_s10   ;;  %s468_s9 = sphi %s498_s9, %s645_s9  }
   0x7   : > { %p60_p0 = scmp.ne.s32.totalorder %s472_s10, %s468_s9  ;;  %p61_p1 = scmp.eq.s32.totalorder %s519_s13, 0 }
   0x8   : > { %p84_p2 = scmp.eq.s32.totalorder %s519_s13, 1  ;;  %p90_p3 = scmp.eq.s32.totalorder %s285_s14, 1 }
   0x9   : > { %p528_p4 = por %p61_p1, %p60_p0  ;;  %p286_p5 = scmp.ge.s32.totalorder %s480_s12, 1 }
   0xa   : > { %p533_p6 = por %p90_p3, %p60_p0  ;;  %p97_p7 = scmp.lt.s32.totalorder %s480_s12, 3 }
   0xb   : > { %s109_s19 = sshll.u32 %s636_s0, 4  ;;  %s549_s21 = sadd.s32 1, %s480_s12   ;;  %s110_s19 = int_to_ptr.hbm [resolvable:$true] %s109_s19 }
   0xc   : > { %p541_p8 = pnand %p286_p5, %p97_p7  ;;  %s44_s22 = ssub.s32 %s480_s12, %s549_s21 }
   0xd   : > { %p45_p12 = scmp.eq.s32.totalorder %s44_s22, 0  ;;  %s47_s23 = sadd.s32 1, %s476_s11 }
   0xe   : > { %p316_p10 = pneg %p541_p8  ;;  %p54_p13 = scmp.ne.s32.totalorder %s476_s11, %s472_s10 }
   0xf   : > { %s482_s24 = smov [#allocation2]   ;;  %p55_p0 = scmp.eq.s32.totalorder %s480_s12, 0 }
  0x10   : > { %p317_p11 = pnand %p316_p10, %p61_p1  ;;  %p564_p3 = por %p84_p2, %p54_p13 }
  0x11   : > { %s559_s25 = scalar_select %p45_p12, %s476_s11, %s47_s23  }
  0x12   : > { %319 = dma.hbm_to_smem (!%p317_p11), %s110_s19, 16, %s482_s24, [#allocation5]  }
  0x13   : > { %s120_s27 = sand.u32 1, %s476_s11   ;;  %p56_p5 = por %p55_p0, %p54_p13 }
  0x14   : > { %p329_p7 = scmp.lt.s32.totalorder %s480_s12, 2  ;;  %s289_s28 = sshll.u32 %s120_s27, 3 }
  0x15   : > { %s290_s29 = sshll.u32 %s480_s12, 3  ;;  %s124_s6 = scalar_lea.vmem [#allocation6], %s289_s28 }
  0x16   : > { %s128_s4 = scalar_lea.hbm %s637_s1, %s290_s29  ;;  %s132_s7 = sshll.u32 %s124_s6, 4  ;;  %s133_s7 = int_to_ptr.vmem [resolvable:$true] %s132_s7 }
  0x17   : > { %s130_s5 = sshll.u32 %s128_s4, 4  ;;  %p574_p10 = pnand %p329_p7, %p56_p5  ;;  %s131_s5 = int_to_ptr.hbm [resolvable:$true] %s130_s5 }
  0x18   : > { %s121_s14 = scalar_lea.sflag [#allocation3], %s120_s27  ;;  %s380_s17 = sshra.s32 %s131_s5, 4  ;;  %s381_s17 = int_to_ptr.hbm [resolvable:$true] %s380_s17 }
  0x19   : > { %s382_s18 = scalar_lea.hbm %s381_s17, 8  ;;  %p384_p11 = pneg %p574_p10 }
  0x1a   : > { %p383_p2 = scmp.ne.s32.totalorder %s381_s17, %s382_s18  ;;  %s387_s23 = scalar_lea.hbm %s637_s1, 16 }
  0x1b   : > { %p388_p0 = scmp.lt.s32.totalorder %s381_s17, %s637_s1  ;;  %p389_p5 = scmp.lt.s32.totalorder %s387_s23, %s382_s18 }
  0x1c   : > { %p385_p12 = pnand %p384_p11, %p383_p2 }
  0x1d   : > { %p390_p7 = por %p389_p5, %p388_p0 }
  0x1e   : > { %p386_p13 = pneg %p385_p12 }
  0x20   : > { %p391_p9 = pnand %p390_p7, %p386_p13 }
  0x22   : > { %394 = shalt.err (!%p391_p9)
}
  0x23   : > { %323 = dma.hbm_to_vmem [thread:$0]  (!%p574_p10), %s131_s5, 128, %s133_s7, %s121_s14  }
  0x24   : > { %141 = sbr.rel (%p541_p8) target bundleno = 75 (0x4b), region = 28 }
  0x29   : > { %455 = dma.done.wait (%p61_p1), [#allocation5], 16  }
  0x2a   : > { %457 = vsyncadd (%p61_p1), [#allocation5], 4294967280  ;;  %s595_s27 = sand.u32 1, %s472_s10  }
  0x2b   : > { %s293_s29 = sshll.u32 %s595_s27, 3  ;;  %s149_s30 = scalar_lea.sflag [#allocation3], %s595_s27 }
  0x2c   : > { %s152_s3 = scalar_lea.vmem [#allocation6], %s293_s29 }
  0x2d   : > { %459 = dma.done.wait (%p528_p4), %s149_s30, 128  }
  0x2e   : > { %461 = vsyncadd (%p528_p4), %s149_s30, 4294967168 }
  0x2f   : > { %158 = sfence }
  0x30   : > { %s295_s20 = sld [smem:[#allocation2 + $0x1]]  ;;  %v177_v0 = vld [vmem:[%s152_s3] sm:$0xff]  ;;  %s297_s5 = sshll.u32 %s519_s13, 3 }
  0x31   : > { %v178_v1 = vfloor.f32 %v177_v0  ;;  %s175_s4 = sld [smem:[#allocation2]]  ;;  %s198_s7 = scalar_lea.hbm %s638_s2, %s297_s5 }
  0x32   : > { %s174_s8 = scalar_lea.vmem [#allocation7], %s293_s29  ;;  %s202_s17 = sshll.u32 %s198_s7, 4  ;;  %s203_s17 = int_to_ptr.hbm [resolvable:$true] %s202_s17 }
  0x33   : > { %s200_s14 = sshll.u32 %s174_s8, 4  ;;  %s188_s18 = scalar_lea.sflag [#allocation4], %s595_s27  ;;  %s201_s14 = int_to_ptr.vmem [resolvable:$true] %s200_s14 }
  0x34   : > { %s424_s13 = sshra.s32 %s203_s17, 4  ;;  %s430_s24 = scalar_lea.hbm %s638_s2, 16  ;;  %s425_s13 = int_to_ptr.hbm [resolvable:$true] %s424_s13 }
  0x35   : > { %s426_s19 = scalar_lea.hbm %s425_s13, 8  ;;  %p431_p9 = scmp.lt.s32.totalorder %s425_s13, %s638_s2 }
  0x36   : > { %v179_v2 = vstv %s295_s20  ;;  %p427_p1 = scmp.ne.s32.totalorder %s425_s13, %s426_s19  ;;  %p432_p10 = scmp.lt.s32.totalorder %s430_s24, %s426_s19 }
  0x37   : > { %v180_v3 = vmul.f32 %v179_v2, %v178_v1  ;;  %v184_v12 = vstv %s175_s4 }
  0x38   : > { %p428_p4 = pnand %p427_p1, %p564_p3  ;;  %p433_p2 = por %p432_p10, %p431_p9 }
  0x39   : > { %v302_v4 = vcvt.f32.s32 %v180_v3  ;;  %v300_v5 = vand.u32 2147483647, %v180_v3  ;;  %v305_v7 = vand.u32 2147483648, %v180_v3 }
  0x3a   : > { %p429_p8 = pneg %p428_p4 }
  0x3b   : > { %v303_v6 = vcvt.s32.f32 %v302_v4  ;;  %vm301_vm0 = vcmp.lt.f32.partialorder %v300_v5, 8388608.0 }
  0x3c   : > { %p434_p11 = pnand %p433_p2, %p429_p8 }
  0x3d   : > { %v304_v8 = vand.u32 2147483647, %v303_v6 }
  0x3f   : > { %v306_v9 = vor.u32 %v305_v7, %v304_v8 }
  0x41   : > { %v307_v10 = vsel %vm301_vm0, %v306_v9, %v180_v3 }
  0x42   : > { %v182_v11 = vmax.f32 %v307_v10, -128.0 }
  0x44   : > { %v183_v13 = vmin.f32 %v182_v11, 127.0 }
  0x46   : > { %v185_v14 = vmul.f32 %v184_v12, %v183_v13 }
  0x48   : > { %186 = vst [vmem:[%s174_s8] sm:$0xff] %v185_v14 }
  0x49   : > { %437 = shalt.err (!%p434_p11)
}
  0x4a   : > { %314 = dma.vmem_to_hbm [thread:$0]  (%p564_p3), %s201_s14, 128, %s203_s17, %s188_s18  }
  0x4b PF: > { %s214_s27 = sand.u32 1, %s468_s9   ;;  %p644_p12 = scmp.ge.s32.totalorder %s480_s12, 2 }
  0x4c   : > { %s215_s30 = scalar_lea.sflag [#allocation4], %s214_s27 }
  0x4d   : > { %p325_p13 = pnand %p644_p12, %p533_p6 }
  0x4f   : > { %p326_p0 = pneg %p325_p13 }
  0x51   : > { %463 = dma.done.wait (%p326_p0), %s215_s30, 128  }
  0x52   : > { %465 = vsyncadd (%p326_p0), %s215_s30, 4294967168  ;;  %p16_p5 = scmp.ge.s32.totalorder %s549_s21, 4   ;;  %s645_s9 = smov %s472_s10 }
  0x53   : > { %s646_s10 = smov %s476_s11  ;;  %s647_s11 = smov %s559_s25 }
  0x54   : > { %s648_s12 = smov %s549_s21  ;;  %18 = sbr.rel (!%p16_p5) target bundleno = 6 (0x6), region = 78 }
  0x59   :  { %221 = vsyncpa [#allocation3], 1 }
  0x5a   :  { %223 = vsyncpa [#allocation3 + $0x1], 1 }
  0x5b   :  { %224 = vsyncpa [#allocation4], 1 }
  0x5c   :  { %226 = vsyncpa [#allocation4 + $0x1], 1 }
  0x5d   :  { %227 = vsyncpa [#allocation5], 1 }
  0x5e   :  { %229 = vsyncpa [#allocation5 + $0x1], 1 }

</bundles_post_ra>
